<compile_context>
chip_gen: v5e
topology: v5e:2x2
jax: 0.10.0
libtpu: 0.0.40
codegen_flags: <defaults>
</compile_context>

<pallas_src>
import jax
import jax.numpy as jnp
from jax.experimental import pallas as pl
from jax.experimental.pallas import tpu as pltpu


def _round_up(x, m):
    return (x + m - 1) // m * m


def _embed_kernel(p_ref, w_ref, pos_ref, out_ref):
    # p_ref:   (tm, K)   bf16 patch rows (batch folded into M)
    # w_ref:   (K,  Hp)  bf16 weight, resident across the grid
    # pos_ref: (tm, Hp)  f32  position embeddings with conv bias pre-folded
    # out_ref: (tm, Hp)  f32
    acc = jnp.dot(p_ref[...], w_ref[...], preferred_element_type=jnp.float32)
    out_ref[...] = (acc + pos_ref[...]).astype(out_ref.dtype)


def embeddings_forward(x_nchw, conv_w, conv_b, pos_emb, patch_size,
                       *, compute_dtype=jnp.bfloat16, tile_m=128):
    """x_nchw: (B, C, H, W); conv_w: (hidden, C, ph, pw); conv_b: (hidden,);
       pos_emb: (1, n_patches, hidden). Returns (B, n_patches, hidden)."""
    B, C, H, W = x_nchw.shape
    ph, pw = patch_size
    hidden = conv_w.shape[0]
    nH, nW = H // ph, W // pw
    nP = nH * nW
    K = C * ph * pw
    M = B * nP                                   # batch folded into matmul M

    # --- glue: patch extraction (reshape/transpose only) ---
    patches = x_nchw.reshape(B, C, nH, ph, nW, pw)
    patches = patches.transpose(0, 2, 4, 1, 3, 5).reshape(M, K)

    # conv weight (hidden, C, ph, pw) -> (K, hidden); contraction order matches
    # the (C, ph, pw) flattening of the patches above.
    w_mat = conv_w.reshape(hidden, K).T

    # Fold conv bias into the position embeddings, broadcast across batch so
    # the kernel sees a single row-aligned (M, hidden) add.
    pos_pb = (pos_emb.reshape(nP, hidden).astype(jnp.float32)
              + conv_b.reshape(1, hidden).astype(jnp.float32))
    pos_full = jnp.tile(pos_pb[None], (B, 1, 1)).reshape(M, hidden)

    # --- pad to MXU / lane-friendly shapes ---
    Hp = _round_up(hidden, 128)                  # lane-dense output stores
    tm = tile_m if M >= tile_m else _round_up(M, 16)
    Mp = _round_up(M, tm)

    patches_p = jnp.pad(patches, ((0, Mp - M), (0, 0))).astype(compute_dtype)
    w_p = jnp.pad(w_mat, ((0, 0), (0, Hp - hidden))).astype(compute_dtype)
    pos_p = jnp.pad(pos_full, ((0, Mp - M), (0, Hp - hidden)))

    out_dtype = x_nchw.dtype
    itemsize = jnp.dtype(compute_dtype).itemsize
    flops = 2 * M * K * hidden
    bytes_accessed = (Mp * K * itemsize            # patches (bf16)
                      + K * Hp * itemsize          # weight (bf16, resident)
                      + Mp * Hp * 4                # pos (+bias) f32
                      + Mp * Hp * jnp.dtype(out_dtype).itemsize)  # output

    out = pl.pallas_call(
        _embed_kernel,
        out_shape=jax.ShapeDtypeStruct((Mp, Hp), out_dtype),
        grid_spec=pltpu.PrefetchScalarGridSpec(
            num_scalar_prefetch=0,
            grid=(Mp // tm,),
            in_specs=[
                pl.BlockSpec((tm, K), lambda i: (i, 0)),    # patch rows
                pl.BlockSpec((K, Hp), lambda i: (0, 0)),    # weight (resident)
                pl.BlockSpec((tm, Hp), lambda i: (i, 0)),   # pos + bias
            ],
            out_specs=pl.BlockSpec((tm, Hp), lambda i: (i, 0)),
        ),
        compiler_params=pltpu.CompilerParams(
            dimension_semantics=("parallel",)),
        cost_estimate=pl.CostEstimate(flops=flops, transcendentals=0,
                                      bytes_accessed=bytes_accessed),
    )(patches_p, w_p, pos_p)

    return out[:M, :hidden].reshape(B, nP, hidden)


def _reference(x_nchw, conv_w, conv_b, pos_emb, patch_size, compute_dtype=None):
    """Pure-JAX reference. compute_dtype=None -> full f32; bfloat16 -> matches
    the kernel's bf16-operand / f32-accumulate math."""
    B, C, H, W = x_nchw.shape
    ph, pw = patch_size
    hidden = conv_w.shape[0]
    nH, nW = H // ph, W // pw
    patches = x_nchw.reshape(B, C, nH, ph, nW, pw).transpose(0, 2, 4, 1, 3, 5)
    patches = patches.reshape(B, nH * nW, C * ph * pw)
    w_mat = conv_w.reshape(hidden, -1).T
    if compute_dtype is not None:
        patches = patches.astype(compute_dtype)
        w_mat = w_mat.astype(compute_dtype)
    acc = jnp.dot(patches, w_mat, preferred_element_type=jnp.float32)
    return acc + conv_b[None, None, :] + pos_emb


if __name__ == "__main__":
    key = jax.random.PRNGKey(0)
    # Small config consistent with the module:
    #   img_size=(16,16), patches.size=(8,8) -> n_patches = 4, hidden_size = 32
    B, C, H, W = 2, 4, 16, 16
    ph, pw = 8, 8
    hidden = 32
    nP = (H // ph) * (W // pw)

    k1, k2, k3, k4 = jax.random.split(key, 4)
    x = jax.random.normal(k1, (B, C, H, W), dtype=jnp.float32)
    conv_w = jax.random.normal(k2, (hidden, C, ph, pw), dtype=jnp.float32) * 0.02
    conv_b = jax.random.normal(k3, (hidden,), dtype=jnp.float32) * 0.02
    # nn.Parameter(torch.zeros(...)) is zero-init; use small random values so
    # the add is actually exercised (deterministic in-script init).
    pos_emb = jax.random.normal(k4, (1, nP, hidden), dtype=jnp.float32) * 0.02

    out = embeddings_forward(x, conv_w, conv_b, pos_emb, (ph, pw))
    out = jax.block_until_ready(out)
    assert out.shape == (B, nP, hidden), out.shape

    # Tight check vs. the bf16-operand / f32-accumulate reference (same math).
    ref_bf16 = _reference(x, conv_w, conv_b, pos_emb, (ph, pw),
                          compute_dtype=jnp.bfloat16)
    err_bf16 = float(jnp.max(jnp.abs(out - ref_bf16)))
    assert jnp.allclose(out, ref_bf16, atol=2e-3, rtol=2e-3), err_bf16

    # Loose sanity check vs. the pure-f32 module math.
    ref_f32 = _reference(x, conv_w, conv_b, pos_emb, (ph, pw))
    err_f32 = float(jnp.max(jnp.abs(out - ref_f32)))
    assert jnp.allclose(out, ref_f32, atol=5e-2, rtol=5e-2), err_f32

    print("KERNEL_OK")
</pallas_src>

<mosaic_0001>
module attributes {stable_mosaic.version = 11 : i64} {
  func.func @_embed_kernel(%arg0: i32, %arg1: memref<16x256xbf16, #tpu.memory_space<vmem>>, %arg2: memref<256x128xbf16, #tpu.memory_space<vmem>>, %arg3: memref<16x128xf32, #tpu.memory_space<vmem>>, %arg4: memref<16x128xf32, #tpu.memory_space<vmem>>) attributes {dimension_semantics = [#tpu.dimension_semantics<parallel>], iteration_bounds = array<i64: 1>, scalar_prefetch = 0 : i64, scratch_operands = 0 : i64, tpu.core_type = #tpu.core_type<tc>, window_params = [{transform_indices = @transform_0, window_bounds = array<i64: 16, 256>}, {pipeline_mode = #tpu.pipeline_mode<synchronous>, transform_indices = @transform_1, window_bounds = array<i64: 256, 128>}, {transform_indices = @transform_2, window_bounds = array<i64: 16, 128>}, {transform_indices = @transform_3, window_bounds = array<i64: 16, 128>}]} {
    %c0 = arith.constant 0 : index
    %c0_0 = arith.constant 0 : index
    %0 = vector.load %arg1[%c0, %c0_0] : memref<16x256xbf16, #tpu.memory_space<vmem>>, vector<16x256xbf16>
    %c0_1 = arith.constant 0 : index
    %c0_2 = arith.constant 0 : index
    %1 = vector.load %arg2[%c0_1, %c0_2] : memref<256x128xbf16, #tpu.memory_space<vmem>>, vector<256x128xbf16>
    %cst = arith.constant dense<0.000000e+00> : vector<16x128xf32>
    %2 = tpu.matmul %0, %1, %cst {dimension_numbers = #tpu.dot_dimension_numbers<[1], [0], [0], [1], [0, 0, 1, 1], [], []>} : vector<16x256xbf16>, vector<256x128xbf16>, vector<16x128xf32> -> vector<16x128xf32>
    %c0_3 = arith.constant 0 : index
    %c0_4 = arith.constant 0 : index
    %3 = vector.load %arg3[%c0_3, %c0_4] : memref<16x128xf32, #tpu.memory_space<vmem>>, vector<16x128xf32>
    %4 = arith.addf %2, %3 : vector<16x128xf32>
    %c0_5 = arith.constant 0 : index
    %c0_6 = arith.constant 0 : index
    %5 = vector.load %arg4[%c0_5, %c0_6] : memref<16x128xf32, #tpu.memory_space<vmem>>, vector<16x128xf32>
    tpu.vector_store %arg4[%c0_5, %c0_6], %4 {strides = array<i32>} : memref<16x128xf32, #tpu.memory_space<vmem>>, vector<16x128xf32>,
    return
  }
  func.func @transform_0(%arg0: i32) -> (i32, i32) {
    %c0_i32 = arith.constant 0 : i32
    %c0_i32_0 = arith.constant 0 : i32
    return %arg0, %c0_i32 : i32, i32
  }
  func.func @transform_1(%arg0: i32) -> (i32, i32) {
    %c0_i32 = arith.constant 0 : i32
    %c0_i32_0 = arith.constant 0 : i32
    %c0_i32_1 = arith.constant 0 : i32
    return %c0_i32, %c0_i32_0 : i32, i32
  }
  func.func @transform_2(%arg0: i32) -> (i32, i32) {
    %c0_i32 = arith.constant 0 : i32
    %c0_i32_0 = arith.constant 0 : i32
    return %arg0, %c0_i32 : i32, i32
  }
  func.func @transform_3(%arg0: i32) -> (i32, i32) {
    %c0_i32 = arith.constant 0 : i32
    %c0_i32_0 = arith.constant 0 : i32
    return %arg0, %c0_i32 : i32, i32
  }
}

</mosaic_0001>

<bundles_post_ra>
// kernel: tpu_custom_call.1
= control target key start
LH: loop header
LB: loop body
LE: loop exit
PB: predicated region body
PF: predicated region fallthrough
CT: control target
= control target key end

     0   :  { %8 = vsyncpa [#allocation3], 0  ;;  %s503_s0 = inlined_call_operand.hbm [shape: bf16[16,256], index: 0, kind: input, shape index: {}]   ;;  %s504_s1 = inlined_call_operand.hbm [shape: bf16[256,128], index: 1, kind: input, shape index: {}]   ;;  %s505_s2 = inlined_call_operand.hbm [shape: f32[16,128], index: 2, kind: input, shape index: {}]   ;;  %s506_s3 = inlined_call_operand.hbm [shape: f32[16,128], index: 3, kind: output, shape index: {}]  }
   0x1   :  { %9 = vsyncpa [#allocation6], 0  ;;  %s28_s14 = sshll.u32 %s504_s1, 4  ;;  %s29_s14 = int_to_ptr.hbm [resolvable:$true] %s28_s14 }
   0x2   :  { %10 = vsyncpa [#allocation4], 0  ;;  %s454_s15 = smov [#allocation5]   ;;  %s15_s19 = sshll.u32 %s503_s0, 4  ;;  %s16_s19 = int_to_ptr.hbm [resolvable:$true] %s15_s19 }
   0x3   :  { %s30_s16 = sshll.u32 %s454_s15, 4  ;;  %s455_s20 = smov 64   ;;  %s31_s16 = int_to_ptr.vmem [resolvable:$true] %s30_s16 }
   0x4   :  { %s456_s21 = smov 4   ;;  %s457_s22 = smov [#allocation2]  }
   0x5   :  { %36 = dma.hbm_to_vmem [thread:$0]  %s29_s14, 2048, %s31_s16, [#allocation6], %s455_s20, %s455_s20, %s456_s21  }
   0x6   :  { %s17_s23 = sshll.u32 %s457_s22, 4  ;;  %s458_s24 = smov 128   ;;  %s18_s23 = int_to_ptr.vmem [resolvable:$true] %s17_s23 }
   0x7   :  { %s459_s25 = smov 8   ;;  %s41_s27 = sshll.u32 %s505_s2, 4  ;;  %s42_s27 = int_to_ptr.hbm [resolvable:$true] %s41_s27 }
   0x8   :  { %23 = dma.hbm_to_vmem [thread:$0]  %s16_s19, 256, %s18_s23, [#allocation3], %s458_s24, %s458_s24, %s459_s25  }
   0x9   :  { %s460_s28 = smov [#allocation7]  }
   0xa   :  { %s43_s0 = sshll.u32 %s460_s28, 4  ;;  %s44_s0 = int_to_ptr.vmem [resolvable:$true] %s43_s0 }
   0xb   :  { %49 = dma.hbm_to_vmem [thread:$0]  %s42_s27, 256, %s44_s0, [#allocation6], %s458_s24, %s458_s24, %s459_s25  }
   0xc   :  { %448 = dma.done.wait [#allocation3], 256  }
   0xd   :  { %449 = vsyncadd [#allocation3], 4294967040 }
   0xe   :  { %450 = dma.done.wait [#allocation6], 2304  }
   0xf   :  { %451 = vsyncadd [#allocation6], 4294964992  ;;  %v335_v0 = vld [vmem:[#allocation5 + $0x38] sm:$0xff]  ;;  %v334_v2 = vld [vmem:[#allocation5 + $0x30] sm:$0xff]  ;;  %s461_s2 = smov [#allocation8]   ;;  %s240_s5 = sshll.u32 %s506_s3, 4  ;;  %s241_s5 = int_to_ptr.hbm [resolvable:$true] %s240_s5 }
  0x10   :  { %v343_v1 = vld [vmem:[#allocation5 + $0x78] sm:$0xff]  ;;  %204 = vmatpush.bf16.msra.mxu0 %v335_v0  ;;  %v342_v3 = vld [vmem:[#allocation5 + $0x70] sm:$0xff]  ;;  %v333_v4 = vld [vmem:[#allocation5 + $0x28] sm:$0xff]  ;;  %s238_s29 = sshll.u32 %s461_s2, 4  ;;  %s239_s29 = int_to_ptr.vmem [resolvable:$true] %s238_s29 }
  0x11   :  { %218 = vmatpush.bf16.msra.mxu1 %v343_v1  ;;  %v341_v5 = vld [vmem:[#allocation5 + $0x68] sm:$0xff]  ;;  %v332_v6 = vld [vmem:[#allocation5 + $0x20] sm:$0xff]  ;;  %v331_v8 = vld [vmem:[#allocation5 + $0x18] sm:$0xff] }
  0x12   :  { %v340_v7 = vld [vmem:[#allocation5 + $0x60] sm:$0xff]  ;;  %v339_v9 = vld [vmem:[#allocation5 + $0x58] sm:$0xff]  ;;  %v330_v10 = vld [vmem:[#allocation5 + $0x10] sm:$0xff] }
  0x13   :  { %v338_v11 = vld [vmem:[#allocation5 + $0x50] sm:$0xff]  ;;  %v329_v12 = vld [vmem:[#allocation5 + $0x8] sm:$0xff]  ;;  %v328_v14 = vld [vmem:[#allocation5] sm:$0xff] }
  0x14   :  { %205 = vmatpush.bf16.msra.mxu0 %v334_v2  ;;  %v337_v13 = vld [vmem:[#allocation5 + $0x48] sm:$0xff]  ;;  %v336_v15 = vld [vmem:[#allocation5 + $0x40] sm:$0xff]  ;;  %v256_v16 = vld [vmem:[#allocation2] sm:$0xf] }
  0x15   :  { %219 = vmatpush.bf16.msra.mxu1 %v342_v3  ;;  %v327_v17 = vld [vmem:[#allocation2 + $0x4] sm:$0xf0]  ;;  %v326_v18 = vld [vmem:[#allocation2 + $0x4] sm:$0xf]  ;;  %v258_v19 = vld [vmem:[#allocation2 + $0x8] sm:$0xf0] }
  0x16   :  { %v257_v20 = vor.u32 %v327_v17, %v256_v16  ;;  %v261_v21 = vor.u32 %v326_v18, %v258_v19  ;;  %v96_v22 = vld [vmem:[#allocation7] sm:$0xff]  ;;  %v97_v27 = vld [vmem:[#allocation7 + $0x8] sm:$0xff] }
  0x18   :  { %206 = vmatpush.bf16.msra.mxu0 %v333_v4 }
  0x19   :  { %220 = vmatpush.bf16.msra.mxu1 %v341_v5 }
  0x1c   :  { %207 = vmatpush.bf16.msra.mxu0 %v332_v6 }
  0x1d   :  { %221 = vmatpush.bf16.msra.mxu1 %v340_v7 }
  0x20   :  { %208 = vmatpush.bf16.msra.mxu0 %v331_v8 }
  0x21   :  { %222 = vmatpush.bf16.msra.mxu1 %v339_v9 }
  0x24   :  { %209 = vmatpush.bf16.msra.mxu0 %v330_v10 }
  0x25   :  { %223 = vmatpush.bf16.msra.mxu1 %v338_v11 }
  0x28   :  { %210 = vmatpush.bf16.msra.mxu0 %v329_v12 }
  0x29   :  { %224 = vmatpush.bf16.msra.mxu1 %v337_v13 }
  0x2c   :  { %211 = vmatpush.bf16.msra.mxu0 %v328_v14 }
  0x2d   :  { %225 = vmatpush.bf16.msra.mxu1 %v336_v15 }
  0x2f   :  { %212 = vmatmul.bf16.vlgmr.msra.gmra.mxu0 %v257_v20 }
  0x30   :  { %226 = vmatmul.bf16.vlgmr.msra.gmra.mxu1 %v261_v21 }
  0xac   :  { %v213_v23 = vpop.f32.mrf.mxu0 }
  0xad   :  { %v227_v24 = vpop.f32.mrf.mxu1  ;;  %v214_v25 = vadd.f32 %v213_v23, %v96_v22 }
  0xaf   :  { %v228_v26 = vadd.f32 %v227_v24, %v214_v25 }
  0xb1   :  { %232 = vst [vmem:[#allocation8] sm:$0xff] %v228_v26 }
  0xb4   :  { %v215_v28 = vpop.f32.mrf.mxu0 }
  0xb5   :  { %v216_v29 = vadd.f32 %v215_v28, %v97_v27  ;;  %v229_v30 = vpop.f32.mrf.mxu1 }
  0xb7   :  { %v230_v31 = vadd.f32 %v229_v30, %v216_v29 }
  0xb9   :  { %233 = vst [vmem:[#allocation8 + $0x8] sm:$0xff] %v230_v31 }
  0xba   :  { %246 = dma.vmem_to_hbm [thread:$0]  %s239_s29, 256, %s241_s5, [#allocation4], %s458_s24, %s458_s24, %s459_s25  }
  0xbb   :  { %452 = dma.done.wait [#allocation4], 256  }
  0xbc   :  { %453 = vsyncadd [#allocation4], 4294967040 }
  0xbd   :  { %251 = vsyncpa [#allocation3], 1 }
  0xbe   :  { %252 = vsyncpa [#allocation6], 1 }
  0xbf   :  { %253 = vsyncpa [#allocation4], 1 }

</bundles_post_ra>
